<compile_context>
chip_gen: v6e
topology: v6e:2x2x1
jax: 0.10.0
libtpu: 0.0.40
codegen_flags: <defaults>
</compile_context>

<pallas_src>
import functools

import numpy as np
import jax
import jax.numpy as jnp
from jax.experimental import pallas as pl
from jax.experimental.pallas import tpu as pltpu


_PAD = 3  # max ASPP dilation (covers d=2 and d=3 branches)


def _round_up(x, m):
    return ((x + m - 1) // m) * m


# ---------------------------------------------------------------------------
# Tiled matmul + bias (+ ReLU) kernel  (used for the backbone convs)
# ---------------------------------------------------------------------------
def _mm_kernel(x_ref, w_ref, b_ref, o_ref, acc_ref, *, relu):
    k = pl.program_id(2)

    @pl.when(k == 0)
    def _():
        acc_ref[...] = jnp.zeros_like(acc_ref)

    acc_ref[...] += jnp.dot(x_ref[...], w_ref[...],
                            preferred_element_type=jnp.float32)

    @pl.when(k == pl.num_programs(2) - 1)
    def _():
        y = acc_ref[...] + b_ref[...]          # bias only in the epilogue
        if relu:
            y = jnp.maximum(y, 0.0)
        o_ref[...] = y.astype(o_ref.dtype)


def matmul_bias_act(x, w, b, relu, *, tm=512, tn=256, tk=512,
                    out_dtype=jnp.bfloat16):
    """y = act(x @ w + b); x:(M,K) w:(K,N) b:(N,).

    bf16 MXU inputs, f32 VMEM accumulator, bf16 output.  K stays un-padded
    (full-dim block) when it fits in one k-step (no dead contraction work);
    N is padded once to a lane-dense multiple of 128.  Defaults give tn=256
    on big problems (v6e/v7x MXU width) and clamp down for small N (v5e-safe).
    """
    M, K = x.shape
    K2, N = w.shape
    assert K == K2
    Mp = _round_up(M, 8)
    tm = min(tm, Mp)
    Mp = _round_up(Mp, tm)
    Np = _round_up(N, 128)
    tn = min(tn, Np)
    Np = _round_up(Np, tn)
    if K <= tk:
        tk, Kp = K, K                      # single k-step, no contraction padding
    else:
        tk = _round_up(tk, 128)
        Kp = _round_up(K, tk)

    xp = jnp.pad(x.astype(jnp.bfloat16), ((0, Mp - M), (0, Kp - K)))
    wp = jnp.pad(w.astype(jnp.bfloat16), ((0, Kp - K), (0, Np - N)))
    bp = jnp.pad(b.astype(jnp.float32).reshape(1, N), ((0, 0), (0, Np - N)))

    out = pl.pallas_call(
        functools.partial(_mm_kernel, relu=relu),
        grid=(Mp // tm, Np // tn, Kp // tk),
        in_specs=[
            pl.BlockSpec((tm, tk), lambda i, j, k: (i, k)),
            pl.BlockSpec((tk, tn), lambda i, j, k: (k, j)),
            pl.BlockSpec((1, tn), lambda i, j, k: (0, j)),
        ],
        out_specs=pl.BlockSpec((tm, tn), lambda i, j, k: (i, j)),
        out_shape=jax.ShapeDtypeStruct((Mp, Np), out_dtype),
        scratch_shapes=[pltpu.VMEM((tm, tn), jnp.float32)],
        compiler_params=pltpu.CompilerParams(
            dimension_semantics=("parallel", "parallel", "arbitrary"),
            # <=48 MiB keeps the same tiles valid on v7x's 64 MiB VMEM
            vmem_limit_bytes=48 * 1024 * 1024),
    )(xp, wp, bp)
    return out[:M, :N]


def conv3x3_s2_relu(x, w, b):
    """3x3 stride-2 'same' conv + ReLU, NHWC input, (kh,kw,Cin,Cout) weight.

    Wrapper-side im2col (stride-2 => only 2.25x expansion, done in bf16);
    output stays bf16 (the next conv / ASPP head consume bf16 anyway)."""
    B, H, W, Cin = x.shape
    kh, kw, _, Cout = w.shape
    Ho, Wo = (H + 2 - 3) // 2 + 1, (W + 2 - 3) // 2 + 1
    xp = jnp.pad(x.astype(jnp.bfloat16), ((0, 0), (1, 1), (1, 1), (0, 0)))
    patches = [xp[:, ky:ky + 2 * Ho:2, kx:kx + 2 * Wo:2, :]
               for ky in range(kh) for kx in range(kw)]
    cols = jnp.concatenate(patches, axis=-1).reshape(B * Ho * Wo, kh * kw * Cin)
    y = matmul_bias_act(cols, w.reshape(kh * kw * Cin, Cout), b, relu=True)
    return y.reshape(B, Ho, Wo, Cout)


# ---------------------------------------------------------------------------
# Fused ASPP head + classifier + bilinear resize kernel (lane-flattened spatial)
# ---------------------------------------------------------------------------
def _aspp_head_kernel(fp_ref, pool_ref, w0_ref, w1_ref, w2_ref, bb_ref,
                      wp_ref, pb_ref, cls_ref, cb_ref, m_ref, o_ref,
                      *, Wp, S, pad):
    # padded feature tile (C, Lflat), loaded ONCE and sliced as values below
    feat = fp_ref[0]

    def slab(dy, dx):
        # conv tap (dy,dx): contiguous lane window of the row-flattened feature;
        # output position (h,w) lives at slab column h*Wp + w.
        s = (pad + dy) * Wp + pad + dx
        return feat[:, s:s + S]                                   # (C, S) bf16

    taps = [(ky - 1, kx - 1) for ky in range(3) for kx in range(3)]
    # taps stacked on the contraction axis -> ONE wide dot per dilated branch
    rhs2 = jnp.concatenate([slab(2 * dy, 2 * dx) for dy, dx in taps], axis=0)
    rhs3 = jnp.concatenate([slab(3 * dy, 3 * dx) for dy, dx in taps], axis=0)

    b0 = jnp.dot(w0_ref[...], slab(0, 0), preferred_element_type=jnp.float32)
    b1 = jnp.dot(w1_ref[...], rhs2, preferred_element_type=jnp.float32)
    b2 = jnp.dot(w2_ref[...], rhs3, preferred_element_type=jnp.float32)

    # branch concat folded into a single projection matmul
    br = jnp.concatenate([b0, b1, b2], axis=0) + bb_ref[...]      # (3Cb, S)
    br = jnp.maximum(br, 0.0).astype(jnp.bfloat16)

    pre = (jnp.dot(wp_ref[...], br, preferred_element_type=jnp.float32)
           + pool_ref[0] + pb_ref[...])                           # (Cp, S)
    proj = jnp.maximum(pre, 0.0).astype(jnp.bfloat16)

    # 1x1 classifier: one wide bf16 dot per batch
    logit = (jnp.dot(cls_ref[...], proj, preferred_element_type=jnp.float32)
             + cb_ref[...])                                       # (1, S) f32

    # valid-column pick + bilinear resize (align_corners=False) + row-flatten
    # folded into one matmul -> lane-dense (1, H*W) store
    o_ref[0] = jnp.dot(logit, m_ref[...], preferred_element_type=jnp.float32)


def _interp_matrix_np(out_size, in_size):
    """PyTorch bilinear, align_corners=False, as a dense (out, in) matrix."""
    A = np.zeros((out_size, in_size), dtype=np.float32)
    scale = in_size / out_size
    for o in range(out_size):
        src = max(scale * (o + 0.5) - 0.5, 0.0)
        i0 = min(int(np.floor(src)), in_size - 1)
        lam = src - i0
        i1 = min(i0 + 1, in_size - 1)
        A[o, i0] += 1.0 - lam
        A[o, i1] += lam
    return A


def _flat_resize_matrix(H, W, Hf, Wf, Wp, S):
    """(S, H*W) matrix: selects the valid slab columns (h*Wp + w) and applies the
    separable bilinear resize, producing a row-flattened (H*W) lane-dense output.
    TODO(synk): for large feature/output sizes, factor back into two matmuls
    (A @ L @ Bt) instead of materializing the O(Hf*Wp*H*W) kron matrix."""
    A = _interp_matrix_np(H, Hf)                       # (H, Hf)
    Bm = _interp_matrix_np(W, Wf)                      # (W, Wf)
    core = np.einsum('yh,xw->hwyx', A, Bm).reshape(Hf, Wf, H * W)
    M = np.zeros((S, H * W), np.float32)
    for h in range(Hf):
        M[h * Wp:h * Wp + Wf, :] = core[h]
    return jnp.asarray(M)


def aspp_head_resize(f, p, H, W):
    """Fused ASPP head (3 conv branches + pooled branch + proj + cls) + resize.

    f: backbone features, NHWC (B, Hf, Wf, C) bf16.  Returns (B, 1, H, W) f32.
    """
    B, Hf, Wf, C = f.shape
    Cb = p['a0_w'].shape[-1]            # 16 branch channels
    Cp = p['proj_w'].shape[-1]          # 32 projected channels
    pad = _PAD
    Hp, Wp = Hf + 2 * pad, Wf + 2 * pad
    S = Hf * Wp                         # row-flattened slab width per tap

    # tiny image-pool branch in plain JAX (enters the kernel as a bias column)
    pooled = jnp.mean(f.astype(jnp.float32), axis=(1, 2))               # (B, C)
    bp = jnp.maximum(pooled @ p['ap_w'] + p['ap_b'], 0.0)               # (B, Cb)
    w_proj = p['proj_w'].reshape(4 * Cb, Cp)                            # (64, 32)
    pool_t = (bp @ w_proj[3 * Cb:]).astype(jnp.float32)[:, :, None]     # (B, Cp, 1)

    # branch weights with taps stacked along the contraction axis
    W0 = p['a0_w'].reshape(C, Cb).T.astype(jnp.bfloat16)                # (Cb, C)
    W1 = (p['a1_w'].reshape(9, C, Cb).transpose(2, 0, 1)
          .reshape(Cb, 9 * C).astype(jnp.bfloat16))                     # (Cb, 9C)
    W2 = (p['a2_w'].reshape(9, C, Cb).transpose(2, 0, 1)
          .reshape(Cb, 9 * C).astype(jnp.bfloat16))
    bb = jnp.concatenate([p['a0_b'], p['a1_b'], p['a2_b']]
                         )[:, None].astype(jnp.float32)                 # (3Cb, 1)
    WpT = w_proj[:3 * Cb].T.astype(jnp.bfloat16)                        # (Cp, 3Cb)
    pb = p['proj_b'][:, None].astype(jnp.float32)                       # (Cp, 1)
    clsT = p['cls_w'].reshape(Cp, 1).T.astype(jnp.bfloat16)             # (1, Cp)
    clsb = p['cls_b'].reshape(1, 1).astype(jnp.float32)

    Mrs = _flat_resize_matrix(H, W, Hf, Wf, Wp, S)                      # (S, H*W)

    # padded feature, channels-first, spatial row-flattened onto the lane axis,
    # with a zero tail so every tap slab slice stays in bounds (and lane-aligned).
    Lflat = _round_up(2 * pad * Wp + 2 * pad + S, 128)
    fp = jnp.pad(f.astype(jnp.bfloat16),
                 ((0, 0), (pad, pad), (pad, pad), (0, 0)))              # (B,Hp,Wp,C)
    fp = jnp.transpose(fp, (0, 3, 1, 2)).reshape(B, C, Hp * Wp)
    fp = jnp.pad(fp, ((0, 0), (0, 0), (0, Lflat - Hp * Wp)))            # (B,C,Lflat)

    out = pl.pallas_call(
        functools.partial(_aspp_head_kernel, Wp=Wp, S=S, pad=pad),
        grid=(B,),
        in_specs=[
            pl.BlockSpec((1, C, Lflat), lambda b: (b, 0, 0)),
            pl.BlockSpec((1, Cp, 1), lambda b: (b, 0, 0)),
            pl.BlockSpec((Cb, C), lambda b: (0, 0)),
            pl.BlockSpec((Cb, 9 * C), lambda b: (0, 0)),
            pl.BlockSpec((Cb, 9 * C), lambda b: (0, 0)),
            pl.BlockSpec((3 * Cb, 1), lambda b: (0, 0)),
            pl.BlockSpec((Cp, 3 * Cb), lambda b: (0, 0)),
            pl.BlockSpec((Cp, 1), lambda b: (0, 0)),
            pl.BlockSpec((1, Cp), lambda b: (0, 0)),
            pl.BlockSpec((1, 1), lambda b: (0, 0)),
            pl.BlockSpec((S, H * W), lambda b: (0, 0)),
        ],
        out_specs=pl.BlockSpec((1, 1, H * W), lambda b: (b, 0, 0)),
        out_shape=jax.ShapeDtypeStruct((B, 1, H * W), jnp.float32),
        compiler_params=pltpu.CompilerParams(
            # batch across TCs (v7x). TODO(synk): for B==1 shard output rows too.
            dimension_semantics=("parallel",),
            vmem_limit_bytes=48 * 1024 * 1024),
    )(fp, pool_t, W0, W1, W2, bb, WpT, pb, clsT, clsb, Mrs)
    return out.reshape(B, 1, H, W)


# ---------------------------------------------------------------------------
# DeepLabV3 forward
# ---------------------------------------------------------------------------
def deeplabv3_forward(x_nchw, p):
    B, Cin, H, W = x_nchw.shape
    x = jnp.transpose(x_nchw, (0, 2, 3, 1))                            # NCHW -> NHWC

    # backbone -> features['out']
    f = conv3x3_s2_relu(x, p['bb1_w'], p['bb1_b'])                     # (B, H/2, W/2, 16)
    f = conv3x3_s2_relu(f, p['bb2_w'], p['bb2_b'])                     # (B, H/4, W/4, 32)

    # classifier (fused ASPP head) + F.interpolate(..., 'bilinear', align_corners=False)
    out = aspp_head_resize(f, p, H, W)                                 # (B, 1, H, W)
    return {'out': out}


def init_params(key):
    ks = jax.random.split(key, 9)

    def conv_init(k, kh, kw, cin, cout):
        fan_in = kh * kw * cin
        return (jax.random.normal(k, (kh, kw, cin, cout), jnp.float32)
                * np.sqrt(2.0 / fan_in)).astype(jnp.float32)

    p = {
        'bb1_w': conv_init(ks[0], 3, 3, 4, 16),   'bb1_b': jnp.zeros((16,), jnp.float32),
        'bb2_w': conv_init(ks[1], 3, 3, 16, 32),  'bb2_b': jnp.zeros((32,), jnp.float32),
        'a0_w':  conv_init(ks[2], 1, 1, 32, 16),  'a0_b':  jnp.zeros((16,), jnp.float32),
        'a1_w':  conv_init(ks[3], 3, 3, 32, 16),  'a1_b':  jnp.zeros((16,), jnp.float32),
        'a2_w':  conv_init(ks[4], 3, 3, 32, 16),  'a2_b':  jnp.zeros((16,), jnp.float32),
        'ap_w':  (jax.random.normal(ks[5], (32, 16), jnp.float32) * np.sqrt(2.0 / 32)),
        'ap_b':  jnp.zeros((16,), jnp.float32),
        'proj_w': conv_init(ks[6], 1, 1, 64, 32), 'proj_b': jnp.zeros((32,), jnp.float32),
        'cls_w': conv_init(ks[7], 1, 1, 32, 1),   'cls_b': jnp.zeros((1,), jnp.float32),
    }
    return p


if __name__ == "__main__":
    key = jax.random.PRNGKey(0)
    kx, kp = jax.random.split(key)
    x = jax.random.normal(kx, (2, 4, 16, 16), jnp.float32)   # NCHW, like PyTorch input
    params = init_params(kp)

    fwd = jax.jit(deeplabv3_forward)
    result = fwd(x, params)
    out = jax.block_until_ready(result['out'])
    assert out.shape == (2, 1, 16, 16), out.shape
    assert bool(jnp.all(jnp.isfinite(out)))
    print("KERNEL_OK")
</pallas_src>

<mosaic_0001>
module attributes {stable_mosaic.version = 11 : i64} {
  func.func @_mm_kernel(%arg0: i32, %arg1: i32, %arg2: i32, %arg3: memref<128x36xbf16, #tpu.memory_space<vmem>>, %arg4: memref<36x128xbf16, #tpu.memory_space<vmem>>, %arg5: memref<1x128xf32, #tpu.memory_space<vmem>>, %arg6: memref<128x128xbf16, #tpu.memory_space<vmem>>, %arg7: memref<128x128xf32, #tpu.memory_space<vmem>>) attributes {dimension_semantics = [#tpu.dimension_semantics<parallel>, #tpu.dimension_semantics<parallel>, #tpu.dimension_semantics<arbitrary>], iteration_bounds = array<i64: 1, 1, 1>, scalar_prefetch = 0 : i64, scratch_operands = 1 : i64, tpu.core_type = #tpu.core_type<tc>, window_params = [{transform_indices = @transform_0, window_bounds = array<i64: 128, 36>}, {transform_indices = @transform_1, window_bounds = array<i64: 36, 128>}, {transform_indices = @transform_2, window_bounds = array<i64: 1, 128>}, {transform_indices = @transform_3, window_bounds = array<i64: 128, 128>}]} {
    %c0_i32 = arith.constant 0 : i32
    %0 = arith.cmpi eq, %arg2, %c0_i32 : i32
    %1 = arith.extui %0 : i1 to i32
    %c0_i32_0 = arith.constant 0 : i32
    %2 = arith.cmpi ne, %1, %c0_i32_0 : i32
    scf.if %2 {
      %cst_10 = arith.constant 0.000000e+00 : f32
      %12 = vector.broadcast %cst_10 : f32 to vector<128x128xf32>
      %c0_11 = arith.constant 0 : index
      %c0_12 = arith.constant 0 : index
      %13 = vector.load %arg7[%c0_11, %c0_12] : memref<128x128xf32, #tpu.memory_space<vmem>>, vector<128x128xf32>
      tpu.vector_store %arg7[%c0_11, %c0_12], %12 {strides = array<i32>} : memref<128x128xf32, #tpu.memory_space<vmem>>, vector<128x128xf32>,
    } else {
    }
    %c0 = arith.constant 0 : index
    %c0_1 = arith.constant 0 : index
    %3 = vector.load %arg7[%c0, %c0_1] : memref<128x128xf32, #tpu.memory_space<vmem>>, vector<128x128xf32>
    %c0_2 = arith.constant 0 : index
    %c0_3 = arith.constant 0 : index
    %4 = vector.load %arg3[%c0_2, %c0_3] : memref<128x36xbf16, #tpu.memory_space<vmem>>, vector<128x36xbf16>
    %c0_4 = arith.constant 0 : index
    %c0_5 = arith.constant 0 : index
    %5 = vector.load %arg4[%c0_4, %c0_5] : memref<36x128xbf16, #tpu.memory_space<vmem>>, vector<36x128xbf16>
    %cst = arith.constant dense<0.000000e+00> : vector<128x128xf32>
    %6 = tpu.matmul %4, %5, %cst {dimension_numbers = #tpu.dot_dimension_numbers<[1], [0], [0], [1], [0, 0, 1, 1], [], []>} : vector<128x36xbf16>, vector<36x128xbf16>, vector<128x128xf32> -> vector<128x128xf32>
    %7 = arith.addf %3, %6 : vector<128x128xf32>
    %c0_6 = arith.constant 0 : index
    %c0_7 = arith.constant 0 : index
    %8 = vector.load %arg7[%c0_6, %c0_7] : memref<128x128xf32, #tpu.memory_space<vmem>>, vector<128x128xf32>
    tpu.vector_store %arg7[%c0_6, %c0_7], %7 {strides = array<i32>} : memref<128x128xf32, #tpu.memory_space<vmem>>, vector<128x128xf32>,
    %c0_i32_8 = arith.constant 0 : i32
    %9 = arith.cmpi eq, %arg2, %c0_i32_8 : i32
    %10 = arith.extui %9 : i1 to i32
    %c0_i32_9 = arith.constant 0 : i32
    %11 = arith.cmpi ne, %10, %c0_i32_9 : i32
    scf.if %11 {
      %c0_10 = arith.constant 0 : index
      %c0_11 = arith.constant 0 : index
      %12 = vector.load %arg7[%c0_10, %c0_11] : memref<128x128xf32, #tpu.memory_space<vmem>>, vector<128x128xf32>
      %c0_12 = arith.constant 0 : index
      %c0_13 = arith.constant 0 : index
      %13 = vector.load %arg5[%c0_12, %c0_13] : memref<1x128xf32, #tpu.memory_space<vmem>>, vector<1x128xf32>
      %14 = vector.broadcast %13 : vector<1x128xf32> to vector<128x128xf32>
      %15 = arith.addf %12, %14 : vector<128x128xf32>
      %cst_14 = arith.constant 0.000000e+00 : f32
      %16 = vector.broadcast %cst_14 : f32 to vector<128x128xf32>
      %17 = arith.maximumf %15, %16 : vector<128x128xf32>
      %18 = arith.truncf %17 : vector<128x128xf32> to vector<128x128xbf16>
      %c0_15 = arith.constant 0 : index
      %c0_16 = arith.constant 0 : index
      %19 = vector.load %arg6[%c0_15, %c0_16] : memref<128x128xbf16, #tpu.memory_space<vmem>>, vector<128x128xbf16>
      tpu.vector_store %arg6[%c0_15, %c0_16], %18 {strides = array<i32>} : memref<128x128xbf16, #tpu.memory_space<vmem>>, vector<128x128xbf16>,
    } else {
    }
    return
  }
  func.func @transform_0(%arg0: i32, %arg1: i32, %arg2: i32) -> (i32, i32) {
    %c0_i32 = arith.constant 0 : i32
    return %arg0, %arg2 : i32, i32
  }
  func.func @transform_1(%arg0: i32, %arg1: i32, %arg2: i32) -> (i32, i32) {
    %c0_i32 = arith.constant 0 : i32
    return %arg2, %arg1 : i32, i32
  }
  func.func @transform_2(%arg0: i32, %arg1: i32, %arg2: i32) -> (i32, i32) {
    %c0_i32 = arith.constant 0 : i32
    %c0_i32_0 = arith.constant 0 : i32
    return %c0_i32, %arg1 : i32, i32
  }
  func.func @transform_3(%arg0: i32, %arg1: i32, %arg2: i32) -> (i32, i32) {
    %c0_i32 = arith.constant 0 : i32
    return %arg0, %arg1 : i32, i32
  }
}

module attributes {stable_mosaic.version = 11 : i64} {
  func.func @_mm_kernel(%arg0: i32, %arg1: i32, %arg2: i32, %arg3: memref<32x144xbf16, #tpu.memory_space<vmem>>, %arg4: memref<144x128xbf16, #tpu.memory_space<vmem>>, %arg5: memref<1x128xf32, #tpu.memory_space<vmem>>, %arg6: memref<32x128xbf16, #tpu.memory_space<vmem>>, %arg7: memref<32x128xf32, #tpu.memory_space<vmem>>) attributes {dimension_semantics = [#tpu.dimension_semantics<parallel>, #tpu.dimension_semantics<parallel>, #tpu.dimension_semantics<arbitrary>], iteration_bounds = array<i64: 1, 1, 1>, scalar_prefetch = 0 : i64, scratch_operands = 1 : i64, tpu.core_type = #tpu.core_type<tc>, window_params = [{transform_indices = @transform_0, window_bounds = array<i64: 32, 144>}, {transform_indices = @transform_1, window_bounds = array<i64: 144, 128>}, {transform_indices = @transform_2, window_bounds = array<i64: 1, 128>}, {transform_indices = @transform_3, window_bounds = array<i64: 32, 128>}]} {
    %c0_i32 = arith.constant 0 : i32
    %0 = arith.cmpi eq, %arg2, %c0_i32 : i32
    %1 = arith.extui %0 : i1 to i32
    %c0_i32_0 = arith.constant 0 : i32
    %2 = arith.cmpi ne, %1, %c0_i32_0 : i32
    scf.if %2 {
      %cst_10 = arith.constant 0.000000e+00 : f32
      %12 = vector.broadcast %cst_10 : f32 to vector<32x128xf32>
      %c0_11 = arith.constant 0 : index
      %c0_12 = arith.constant 0 : index
      %13 = vector.load %arg7[%c0_11, %c0_12] : memref<32x128xf32, #tpu.memory_space<vmem>>, vector<32x128xf32>
      tpu.vector_store %arg7[%c0_11, %c0_12], %12 {strides = array<i32>} : memref<32x128xf32, #tpu.memory_space<vmem>>, vector<32x128xf32>,
    } else {
    }
    %c0 = arith.constant 0 : index
    %c0_1 = arith.constant 0 : index
    %3 = vector.load %arg7[%c0, %c0_1] : memref<32x128xf32, #tpu.memory_space<vmem>>, vector<32x128xf32>
    %c0_2 = arith.constant 0 : index
    %c0_3 = arith.constant 0 : index
    %4 = vector.load %arg3[%c0_2, %c0_3] : memref<32x144xbf16, #tpu.memory_space<vmem>>, vector<32x144xbf16>
    %c0_4 = arith.constant 0 : index
    %c0_5 = arith.constant 0 : index
    %5 = vector.load %arg4[%c0_4, %c0_5] : memref<144x128xbf16, #tpu.memory_space<vmem>>, vector<144x128xbf16>
    %cst = arith.constant dense<0.000000e+00> : vector<32x128xf32>
    %6 = tpu.matmul %4, %5, %cst {dimension_numbers = #tpu.dot_dimension_numbers<[1], [0], [0], [1], [0, 0, 1, 1], [], []>} : vector<32x144xbf16>, vector<144x128xbf16>, vector<32x128xf32> -> vector<32x128xf32>
    %7 = arith.addf %3, %6 : vector<32x128xf32>
    %c0_6 = arith.constant 0 : index
    %c0_7 = arith.constant 0 : index
    %8 = vector.load %arg7[%c0_6, %c0_7] : memref<32x128xf32, #tpu.memory_space<vmem>>, vector<32x128xf32>
    tpu.vector_store %arg7[%c0_6, %c0_7], %7 {strides = array<i32>} : memref<32x128xf32, #tpu.memory_space<vmem>>, vector<32x128xf32>,
    %c0_i32_8 = arith.constant 0 : i32
    %9 = arith.cmpi eq, %arg2, %c0_i32_8 : i32
    %10 = arith.extui %9 : i1 to i32
    %c0_i32_9 = arith.constant 0 : i32
    %11 = arith.cmpi ne, %10, %c0_i32_9 : i32
    scf.if %11 {
      %c0_10 = arith.constant 0 : index
      %c0_11 = arith.constant 0 : index
      %12 = vector.load %arg7[%c0_10, %c0_11] : memref<32x128xf32, #tpu.memory_space<vmem>>, vector<32x128xf32>
      %c0_12 = arith.constant 0 : index
      %c0_13 = arith.constant 0 : index
      %13 = vector.load %arg5[%c0_12, %c0_13] : memref<1x128xf32, #tpu.memory_space<vmem>>, vector<1x128xf32>
      %14 = vector.broadcast %13 : vector<1x128xf32> to vector<32x128xf32>
      %15 = arith.addf %12, %14 : vector<32x128xf32>
      %cst_14 = arith.constant 0.000000e+00 : f32
      %16 = vector.broadcast %cst_14 : f32 to vector<32x128xf32>
      %17 = arith.maximumf %15, %16 : vector<32x128xf32>
      %18 = arith.truncf %17 : vector<32x128xf32> to vector<32x128xbf16>
      %c0_15 = arith.constant 0 : index
      %c0_16 = arith.constant 0 : index
      %19 = vector.load %arg6[%c0_15, %c0_16] : memref<32x128xbf16, #tpu.memory_space<vmem>>, vector<32x128xbf16>
      tpu.vector_store %arg6[%c0_15, %c0_16], %18 {strides = array<i32>} : memref<32x128xbf16, #tpu.memory_space<vmem>>, vector<32x128xbf16>,
    } else {
    }
    return
  }
  func.func @transform_0(%arg0: i32, %arg1: i32, %arg2: i32) -> (i32, i32) {
    %c0_i32 = arith.constant 0 : i32
    return %arg0, %arg2 : i32, i32
  }
  func.func @transform_1(%arg0: i32, %arg1: i32, %arg2: i32) -> (i32, i32) {
    %c0_i32 = arith.constant 0 : i32
    return %arg2, %arg1 : i32, i32
  }
  func.func @transform_2(%arg0: i32, %arg1: i32, %arg2: i32) -> (i32, i32) {
    %c0_i32 = arith.constant 0 : i32
    %c0_i32_0 = arith.constant 0 : i32
    return %c0_i32, %arg1 : i32, i32
  }
  func.func @transform_3(%arg0: i32, %arg1: i32, %arg2: i32) -> (i32, i32) {
    %c0_i32 = arith.constant 0 : i32
    return %arg0, %arg1 : i32, i32
  }
}

module attributes {stable_mosaic.version = 11 : i64} {
  func.func @_aspp_head_kernel(%arg0: i32, %arg1: memref<1x32x128xbf16, #tpu.memory_space<vmem>>, %arg2: memref<1x32x1xf32, #tpu.memory_space<vmem>>, %arg3: memref<16x32xbf16, #tpu.memory_space<vmem>>, %arg4: memref<16x288xbf16, #tpu.memory_space<vmem>>, %arg5: memref<16x288xbf16, #tpu.memory_space<vmem>>, %arg6: memref<48x1xf32, #tpu.memory_space<vmem>>, %arg7: memref<32x48xbf16, #tpu.memory_space<vmem>>, %arg8: memref<32x1xf32, #tpu.memory_space<vmem>>, %arg9: memref<1x32xbf16, #tpu.memory_space<vmem>>, %arg10: memref<1x1xf32, #tpu.memory_space<vmem>>, %arg11: memref<40x256xf32, #tpu.memory_space<vmem>>, %arg12: memref<1x1x256xf32, #tpu.memory_space<vmem>>) attributes {dimension_semantics = [#tpu.dimension_semantics<parallel>], iteration_bounds = array<i64: 2>, scalar_prefetch = 0 : i64, scratch_operands = 0 : i64, tpu.core_type = #tpu.core_type<tc>, window_params = [{transform_indices = @transform_0, window_bounds = array<i64: 1, 32, 128>}, {transform_indices = @transform_1, window_bounds = array<i64: 1, 32, 1>}, {pipeline_mode = #tpu.pipeline_mode<synchronous>, transform_indices = @transform_2, window_bounds = array<i64: 16, 32>}, {pipeline_mode = #tpu.pipeline_mode<synchronous>, transform_indices = @transform_3, window_bounds = array<i64: 16, 288>}, {pipeline_mode = #tpu.pipeline_mode<synchronous>, transform_indices = @transform_4, window_bounds = array<i64: 16, 288>}, {pipeline_mode = #tpu.pipeline_mode<synchronous>, transform_indices = @transform_5, window_bounds = array<i64: 48, 1>}, {pipeline_mode = #tpu.pipeline_mode<synchronous>, transform_indices = @transform_6, window_bounds = array<i64: 32, 48>}, {pipeline_mode = #tpu.pipeline_mode<synchronous>, transform_indices = @transform_7, window_bounds = array<i64: 32, 1>}, {pipeline_mode = #tpu.pipeline_mode<synchronous>, transform_indices = @transform_8, window_bounds = array<i64: 1, 32>}, {pipeline_mode = #tpu.pipeline_mode<synchronous>, transform_indices = @transform_9, window_bounds = array<i64: 1, 1>}, {pipeline_mode = #tpu.pipeline_mode<synchronous>, transform_indices = @transform_10, window_bounds = array<i64: 40, 256>}, {transform_indices = @transform_11, window_bounds = array<i64: 1, 1, 256>}]} {
    %c0 = arith.constant 0 : index
    %c0_0 = arith.constant 0 : index
    %c0_1 = arith.constant 0 : index
    %0 = vector.load %arg1[%c0, %c0_0, %c0_1] : memref<1x32x128xbf16, #tpu.memory_space<vmem>>, vector<1x32x128xbf16>
    %1 = vector.shape_cast %0 : vector<1x32x128xbf16> to vector<32x128xbf16>
    %2 = vector.extract_strided_slice %1 {offsets = [0, 11], sizes = [32, 40], strides = [1, 1]} : vector<32x128xbf16> to vector<32x40xbf16>
    %3 = vector.extract_strided_slice %1 {offsets = [0, 13], sizes = [32, 40], strides = [1, 1]} : vector<32x128xbf16> to vector<32x40xbf16>
    %4 = vector.extract_strided_slice %1 {offsets = [0, 15], sizes = [32, 40], strides = [1, 1]} : vector<32x128xbf16> to vector<32x40xbf16>
    %5 = vector.extract_strided_slice %1 {offsets = [0, 31], sizes = [32, 40], strides = [1, 1]} : vector<32x128xbf16> to vector<32x40xbf16>
    %6 = vector.extract_strided_slice %1 {offsets = [0, 33], sizes = [32, 40], strides = [1, 1]} : vector<32x128xbf16> to vector<32x40xbf16>
    %7 = vector.extract_strided_slice %1 {offsets = [0, 35], sizes = [32, 40], strides = [1, 1]} : vector<32x128xbf16> to vector<32x40xbf16>
    %8 = vector.extract_strided_slice %1 {offsets = [0, 51], sizes = [32, 40], strides = [1, 1]} : vector<32x128xbf16> to vector<32x40xbf16>
    %9 = vector.extract_strided_slice %1 {offsets = [0, 53], sizes = [32, 40], strides = [1, 1]} : vector<32x128xbf16> to vector<32x40xbf16>
    %10 = vector.extract_strided_slice %1 {offsets = [0, 55], sizes = [32, 40], strides = [1, 1]} : vector<32x128xbf16> to vector<32x40xbf16>
    %11 = tpu.concatenate %2, %3, %4, %5, %6, %7, %8, %9, %10 in 0 : vector<32x40xbf16>, vector<32x40xbf16>, vector<32x40xbf16>, vector<32x40xbf16>, vector<32x40xbf16>, vector<32x40xbf16>, vector<32x40xbf16>, vector<32x40xbf16>, vector<32x40xbf16> -> vector<288x40xbf16>
    %12 = vector.extract_strided_slice %1 {offsets = [0, 0], sizes = [32, 40], strides = [1, 1]} : vector<32x128xbf16> to vector<32x40xbf16>
    %13 = vector.extract_strided_slice %1 {offsets = [0, 3], sizes = [32, 40], strides = [1, 1]} : vector<32x128xbf16> to vector<32x40xbf16>
    %14 = vector.extract_strided_slice %1 {offsets = [0, 6], sizes = [32, 40], strides = [1, 1]} : vector<32x128xbf16> to vector<32x40xbf16>
    %15 = vector.extract_strided_slice %1 {offsets = [0, 30], sizes = [32, 40], strides = [1, 1]} : vector<32x128xbf16> to vector<32x40xbf16>
    %16 = vector.extract_strided_slice %1 {offsets = [0, 33], sizes = [32, 40], strides = [1, 1]} : vector<32x128xbf16> to vector<32x40xbf16>
    %17 = vector.extract_strided_slice %1 {offsets = [0, 36], sizes = [32, 40], strides = [1, 1]} : vector<32x128xbf16> to vector<32x40xbf16>
    %18 = vector.extract_strided_slice %1 {offsets = [0, 60], sizes = [32, 40], strides = [1, 1]} : vector<32x128xbf16> to vector<32x40xbf16>
    %19 = vector.extract_strided_slice %1 {offsets = [0, 63], sizes = [32, 40], strides = [1, 1]} : vector<32x128xbf16> to vector<32x40xbf16>
    %20 = vector.extract_strided_slice %1 {offsets = [0, 66], sizes = [32, 40], strides = [1, 1]} : vector<32x128xbf16> to vector<32x40xbf16>
    %21 = tpu.concatenate %12, %13, %14, %15, %16, %17, %18, %19, %20 in 0 : vector<32x40xbf16>, vector<32x40xbf16>, vector<32x40xbf16>, vector<32x40xbf16>, vector<32x40xbf16>, vector<32x40xbf16>, vector<32x40xbf16>, vector<32x40xbf16>, vector<32x40xbf16> -> vector<288x40xbf16>
    %c0_2 = arith.constant 0 : index
    %c0_3 = arith.constant 0 : index
    %22 = vector.load %arg3[%c0_2, %c0_3] : memref<16x32xbf16, #tpu.memory_space<vmem>>, vector<16x32xbf16>
    %23 = vector.extract_strided_slice %1 {offsets = [0, 33], sizes = [32, 40], strides = [1, 1]} : vector<32x128xbf16> to vector<32x40xbf16>
    %cst = arith.constant dense<0.000000e+00> : vector<16x40xf32>
    %24 = tpu.matmul %22, %23, %cst {dimension_numbers = #tpu.dot_dimension_numbers<[1], [0], [0], [1], [0, 0, 1, 1], [], []>} : vector<16x32xbf16>, vector<32x40xbf16>, vector<16x40xf32> -> vector<16x40xf32>
    %c0_4 = arith.constant 0 : index
    %c0_5 = arith.constant 0 : index
    %25 = vector.load %arg4[%c0_4, %c0_5] : memref<16x288xbf16, #tpu.memory_space<vmem>>, vector<16x288xbf16>
    %cst_6 = arith.constant dense<0.000000e+00> : vector<16x40xf32>
    %26 = tpu.matmul %25, %11, %cst_6 {dimension_numbers = #tpu.dot_dimension_numbers<[1], [0], [0], [1], [0, 0, 1, 1], [], []>} : vector<16x288xbf16>, vector<288x40xbf16>, vector<16x40xf32> -> vector<16x40xf32>
    %c0_7 = arith.constant 0 : index
    %c0_8 = arith.constant 0 : index
    %27 = vector.load %arg5[%c0_7, %c0_8] : memref<16x288xbf16, #tpu.memory_space<vmem>>, vector<16x288xbf16>
    %cst_9 = arith.constant dense<0.000000e+00> : vector<16x40xf32>
    %28 = tpu.matmul %27, %21, %cst_9 {dimension_numbers = #tpu.dot_dimension_numbers<[1], [0], [0], [1], [0, 0, 1, 1], [], []>} : vector<16x288xbf16>, vector<288x40xbf16>, vector<16x40xf32> -> vector<16x40xf32>
    %29 = tpu.concatenate %24, %26, %28 in 0 : vector<16x40xf32>, vector<16x40xf32>, vector<16x40xf32> -> vector<48x40xf32>
    %c0_10 = arith.constant 0 : index
    %c0_11 = arith.constant 0 : index
    %30 = vector.load %arg6[%c0_10, %c0_11] : memref<48x1xf32, #tpu.memory_space<vmem>>, vector<48x1xf32>
    %31 = vector.broadcast %30 : vector<48x1xf32> to vector<48x40xf32>
    %32 = arith.addf %29, %31 : vector<48x40xf32>
    %cst_12 = arith.constant 0.000000e+00 : f32
    %33 = vector.broadcast %cst_12 : f32 to vector<48x40xf32>
    %34 = arith.maximumf %32, %33 : vector<48x40xf32>
    %35 = arith.truncf %34 : vector<48x40xf32> to vector<48x40xbf16>
    %c0_13 = arith.constant 0 : index
    %c0_14 = arith.constant 0 : index
    %36 = vector.load %arg7[%c0_13, %c0_14] : memref<32x48xbf16, #tpu.memory_space<vmem>>, vector<32x48xbf16>
    %cst_15 = arith.constant dense<0.000000e+00> : vector<32x40xf32>
    %37 = tpu.matmul %36, %35, %cst_15 {dimension_numbers = #tpu.dot_dimension_numbers<[1], [0], [0], [1], [0, 0, 1, 1], [], []>} : vector<32x48xbf16>, vector<48x40xbf16>, vector<32x40xf32> -> vector<32x40xf32>
    %c0_16 = arith.constant 0 : index
    %c0_17 = arith.constant 0 : index
    %c0_18 = arith.constant 0 : index
    %38 = vector.load %arg2[%c0_16, %c0_17, %c0_18] : memref<1x32x1xf32, #tpu.memory_space<vmem>>, vector<1x32x1xf32>
    %39 = vector.shape_cast %38 : vector<1x32x1xf32> to vector<32x1xf32>
    %40 = vector.broadcast %39 : vector<32x1xf32> to vector<32x40xf32>
    %41 = arith.addf %37, %40 : vector<32x40xf32>
    %c0_19 = arith.constant 0 : index
    %c0_20 = arith.constant 0 : index
    %42 = vector.load %arg8[%c0_19, %c0_20] : memref<32x1xf32, #tpu.memory_space<vmem>>, vector<32x1xf32>
    %43 = vector.broadcast %42 : vector<32x1xf32> to vector<32x40xf32>
    %44 = arith.addf %41, %43 : vector<32x40xf32>
    %cst_21 = arith.constant 0.000000e+00 : f32
    %45 = vector.broadcast %cst_21 : f32 to vector<32x40xf32>
    %46 = arith.maximumf %44, %45 : vector<32x40xf32>
    %47 = arith.truncf %46 : vector<32x40xf32> to vector<32x40xbf16>
    %c0_22 = arith.constant 0 : index
    %c0_23 = arith.constant 0 : index
    %48 = vector.load %arg9[%c0_22, %c0_23] : memref<1x32xbf16, #tpu.memory_space<vmem>>, vector<1x32xbf16>
    %cst_24 = arith.constant dense<0.000000e+00> : vector<1x40xf32>
    %49 = tpu.matmul %48, %47, %cst_24 {dimension_numbers = #tpu.dot_dimension_numbers<[1], [0], [0], [1], [0, 0, 1, 1], [], []>} : vector<1x32xbf16>, vector<32x40xbf16>, vector<1x40xf32> -> vector<1x40xf32>
    %c0_25 = arith.constant 0 : index
    %c0_26 = arith.constant 0 : index
    %50 = vector.load %arg10[%c0_25, %c0_26] : memref<1x1xf32, #tpu.memory_space<vmem>>, vector<1x1xf32>
    %51 = vector.broadcast %50 : vector<1x1xf32> to vector<1x40xf32>
    %52 = arith.addf %49, %51 : vector<1x40xf32>
    %c0_27 = arith.constant 0 : index
    %c0_28 = arith.constant 0 : index
    %53 = vector.load %arg11[%c0_27, %c0_28] : memref<40x256xf32, #tpu.memory_space<vmem>>, vector<40x256xf32>
    %cst_29 = arith.constant dense<0.000000e+00> : vector<1x256xf32>
    %54 = tpu.matmul %52, %53, %cst_29 {dimension_numbers = #tpu.dot_dimension_numbers<[1], [0], [0], [1], [0, 0, 1, 1], [], []>} : vector<1x40xf32>, vector<40x256xf32>, vector<1x256xf32> -> vector<1x256xf32>
    %c0_30 = arith.constant 0 : index
    %c0_31 = arith.constant 0 : index
    %c0_32 = arith.constant 0 : index
    %55 = vector.load %arg12[%c0_30, %c0_31, %c0_32] : memref<1x1x256xf32, #tpu.memory_space<vmem>>, vector<1x1x256xf32>
    %56 = vector.shape_cast %55 : vector<1x1x256xf32> to vector<1x256xf32>
    %57 = vector.shape_cast %54 : vector<1x256xf32> to vector<1x1x256xf32>
    tpu.vector_store %arg12[%c0_30, %c0_31, %c0_32], %57 {strides = array<i32>} : memref<1x1x256xf32, #tpu.memory_space<vmem>>, vector<1x1x256xf32>,
    return
  }
  func.func @transform_0(%arg0: i32) -> (i32, i32, i32) {
    %c0_i32 = arith.constant 0 : i32
    %c0_i32_0 = arith.constant 0 : i32
    %c0_i32_1 = arith.constant 0 : i32
    return %arg0, %c0_i32, %c0_i32_0 : i32, i32, i32
  }
  func.func @transform_1(%arg0: i32) -> (i32, i32, i32) {
    %c0_i32 = arith.constant 0 : i32
    %c0_i32_0 = arith.constant 0 : i32
    %c0_i32_1 = arith.constant 0 : i32
    return %arg0, %c0_i32, %c0_i32_0 : i32, i32, i32
  }
  func.func @transform_2(%arg0: i32) -> (i32, i32) {
    %c0_i32 = arith.constant 0 : i32
    %c0_i32_0 = arith.constant 0 : i32
    %c0_i32_1 = arith.constant 0 : i32
    return %c0_i32, %c0_i32_0 : i32, i32
  }
  func.func @transform_3(%arg0: i32) -> (i32, i32) {
    %c0_i32 = arith.constant 0 : i32
    %c0_i32_0 = arith.constant 0 : i32
    %c0_i32_1 = arith.constant 0 : i32
    return %c0_i32, %c0_i32_0 : i32, i32
  }
  func.func @transform_4(%arg0: i32) -> (i32, i32) {
    %c0_i32 = arith.constant 0 : i32
    %c0_i32_0 = arith.constant 0 : i32
    %c0_i32_1 = arith.constant 0 : i32
    return %c0_i32, %c0_i32_0 : i32, i32
  }
  func.func @transform_5(%arg0: i32) -> (i32, i32) {
    %c0_i32 = arith.constant 0 : i32
    %c0_i32_0 = arith.constant 0 : i32
    %c0_i32_1 = arith.constant 0 : i32
    return %c0_i32, %c0_i32_0 : i32, i32
  }
  func.func @transform_6(%arg0: i32) -> (i32, i32) {
    %c0_i32 = arith.constant 0 : i32
    %c0_i32_0 = arith.constant 0 : i32
    %c0_i32_1 = arith.constant 0 : i32
    return %c0_i32, %c0_i32_0 : i32, i32
  }
  func.func @transform_7(%arg0: i32) -> (i32, i32) {
    %c0_i32 = arith.constant 0 : i32
    %c0_i32_0 = arith.constant 0 : i32
    %c0_i32_1 = arith.constant 0 : i32
    return %c0_i32, %c0_i32_0 : i32, i32
  }
  func.func @transform_8(%arg0: i32) -> (i32, i32) {
    %c0_i32 = arith.constant 0 : i32
    %c0_i32_0 = arith.constant 0 : i32
    %c0_i32_1 = arith.constant 0 : i32
    return %c0_i32, %c0_i32_0 : i32, i32
  }
  func.func @transform_9(%arg0: i32) -> (i32, i32) {
    %c0_i32 = arith.constant 0 : i32
    %c0_i32_0 = arith.constant 0 : i32
    %c0_i32_1 = arith.constant 0 : i32
    return %c0_i32, %c0_i32_0 : i32, i32
  }
  func.func @transform_10(%arg0: i32) -> (i32, i32) {
    %c0_i32 = arith.constant 0 : i32
    %c0_i32_0 = arith.constant 0 : i32
    %c0_i32_1 = arith.constant 0 : i32
    return %c0_i32, %c0_i32_0 : i32, i32
  }
  func.func @transform_11(%arg0: i32) -> (i32, i32, i32) {
    %c0_i32 = arith.constant 0 : i32
    %c0_i32_0 = arith.constant 0 : i32
    %c0_i32_1 = arith.constant 0 : i32
    return %arg0, %c0_i32, %c0_i32_0 : i32, i32, i32
  }
}

</mosaic_0001>

<bundles_post_ra>
// kernel: deeplabv3_forward.3
= control target key start
LH: loop header
LB: loop body
LE: loop exit
PB: predicated region body
PF: predicated region fallthrough
CT: control target
= control target key end

     0   :  { %vm152_vm0 = vcmask 1041408   ;;  %vm127_vm1 = vcmask 293888   ;;  %s666_s1 = inlined_call_operand.vmem [shape: bf16[36,128], index: 1, kind: input, shape index: {}]   ;;  %s667_s0 = inlined_call_operand.vmem [shape: bf16[128,36], index: 0, kind: input, shape index: {}]   ;;  %s668_s2 = inlined_call_operand.vmem [shape: f32[1,128], index: 2, kind: input, shape index: {}]   ;;  %s669_s3 = inlined_call_operand.vmem [shape: bf16[128,128], index: 3, kind: output, shape index: {}]  }
   0x1   :  { %v567_v0 = vld [vmem:[%s666_s1 + $0x10] ss:$0 sps:$4 sm:$0x33]   ;;  %v568_v1 = vld [vmem:[%s666_s1 + $0x8] sm:$0xff]   ;;  %v569_v3 = vld [vmem:[%s666_s1] sm:$0xff]  }
   0x2   :  { %565 = vmatprep.subr.msk.bf16.mxu0 %vm152_vm0, %v567_v0  ;;  %566 = vmatprep.subr.msk.bf16.mxu1 %vm152_vm0, %v567_v0  ;;  %v154_v2 = vsel %vm152_vm0, %v567_v0, 0  ;;  %v570_v4 = vld [vmem:[%s667_s0] sm:$0xff]   ;;  %v572_v6 = vld [vmem:[%s667_s0 + $0x8] sm:$0xff]   ;;  %v574_v8 = vld [vmem:[%s667_s0 + $0x10] sm:$0xff]  }
   0x3   :  { %538 = vmatpush3.bf16.msra.mxu0 %v154_v2  ;;  %562 = vmatpush3.bf16.msra.mxu1 %v154_v2  ;;  %v571_v5 = vld [vmem:[%s667_s0 + $0x20] sm:$0xff]   ;;  %v573_v7 = vld [vmem:[%s667_s0 + $0x28] sm:$0xff]   ;;  %v575_v9 = vld [vmem:[%s667_s0 + $0x30] sm:$0xff]  }
   0x4   :  { %539 = vmatprep.subr.bf16.mxu0 %v568_v1  ;;  %560 = vmatprep.subr.bf16.mxu1 %v568_v1  ;;  %v576_v10 = vld [vmem:[%s667_s0 + $0x18] sm:$0xff]   ;;  %v446_v12 = vld [vmem:[%s668_s2] ss:$0 sm:$0xff] }
   0x5   :  { %543 = vmatprep.mubr.msk.bf16.mxu0 %vm127_vm1, %v570_v4  ;;  %551 = vmatprep.mubr.msk.bf16.mxu1 %vm127_vm1, %v571_v5  ;;  %v577_v11 = vld [vmem:[%s667_s0 + $0x38] sm:$0xff]  }
   0x7   :  { %540 = vmatpush3.bf16.msra.mxu0 %v568_v1  ;;  %563 = vmatpush3.bf16.msra.mxu1 %v568_v1 }
   0x8   :  { %541 = vmatprep.subr.bf16.mxu0 %v569_v3  ;;  %561 = vmatprep.subr.bf16.mxu1 %v569_v3 }
   0xb   :  { %542 = vmatpush3.bf16.msra.mxu0 %v569_v3  ;;  %564 = vmatpush3.bf16.msra.mxu1 %v569_v3 }
   0xe   :  { %544 = vmatmul.mubr.msk.bf16.vlgmr.msra.gmra.mxu0 %vm127_vm1, %v572_v6  ;;  %552 = vmatmul.mubr.msk.bf16.vlgmr.msra.gmra.mxu1 %vm127_vm1, %v573_v7 }
   0xf   :  { %547 = vmatprep.mubr.msk.bf16.mxu0 %vm127_vm1, %v574_v8  ;;  %555 = vmatprep.mubr.msk.bf16.mxu1 %vm127_vm1, %v575_v9 }
  0x16   :  { %548 = vmatmul.mubr.msk.bf16.gmra.mxu0 %vm127_vm1, %v576_v10  ;;  %556 = vmatmul.mubr.msk.bf16.gmra.mxu1 %vm127_vm1, %v577_v11 }
  0xce   :  { %v545_v13 = vpop.f32.mrf.mxu0  ;;  %v553_v14 = vpop.f32.mrf.mxu1 }
  0xcf   :  { %v313_v15 = vadd.f32 %v545_v13, %v446_v12  ;;  %v321_v16 = vadd.f32 %v553_v14, %v446_v12 }
  0xd0   :  { %v190_v17 = vpop.f32.mrf.mxu0  ;;  %v222_v18 = vpop.f32.mrf.mxu1 }
  0xd1   :  { %v311_v19 = vadd.f32 %v446_v12, %v190_v17  ;;  %v319_v20 = vadd.f32 %v446_v12, %v222_v18  ;;  %v329_v25 = vmax.f32 %v313_v15, 0.0  ;;  %v337_v26 = vmax.f32 %v321_v16, 0.0 }
  0xd2   :  { %v546_v21 = vpop.f32.mrf.mxu0  ;;  %v554_v22 = vpop.f32.mrf.mxu1 }
  0xd3   :  { %v314_v23 = vadd.f32 %v546_v21, %v446_v12  ;;  %v322_v24 = vadd.f32 %v554_v22, %v446_v12  ;;  %v327_v33 = vmax.f32 %v311_v19, 0.0  ;;  %v335_v34 = vmax.f32 %v319_v20, 0.0 }
  0xd4   :  { %v193_v27 = vpop.f32.mrf.mxu0  ;;  %v225_v28 = vpop.f32.mrf.mxu1 }
  0xd5   :  { %v330_v29 = vmax.f32 %v314_v23, 0.0  ;;  %v338_v30 = vmax.f32 %v322_v24, 0.0  ;;  %v312_v31 = vadd.f32 %v446_v12, %v193_v27  ;;  %v320_v32 = vadd.f32 %v446_v12, %v225_v28 }
  0xd6   :  { %v549_v35 = vpop.f32.mrf.mxu0  ;;  %v557_v36 = vpop.f32.mrf.mxu1 }
  0xd7   :  { %v487_v37 = vpack.c.bf16 %v330_v29, %v329_v25  ;;  %v507_v38 = vpack.c.bf16 %v338_v30, %v337_v26  ;;  %v328_v39 = vmax.f32 %v312_v31, 0.0  ;;  %v336_v40 = vmax.f32 %v320_v32, 0.0 }
  0xd8   :  { %v317_v41 = vadd.f32 %v549_v35, %v446_v12  ;;  %v325_v42 = vadd.f32 %v557_v36, %v446_v12  ;;  %v206_v43 = vpop.f32.mrf.mxu0  ;;  %v238_v44 = vpop.f32.mrf.mxu1 }
  0xd9   :  { %519 = vst [vmem:[%s669_s3 + $0x8] sm:$0xff] %v487_v37   ;;  %523 = vst [vmem:[%s669_s3 + $0x28] sm:$0xff] %v507_v38   ;;  %v482_v45 = vpack.c.bf16 %v328_v39, %v327_v33  ;;  %v502_v46 = vpack.c.bf16 %v336_v40, %v335_v34  ;;  %v315_v47 = vadd.f32 %v446_v12, %v206_v43 }
  0xda   :  { %v323_v48 = vadd.f32 %v446_v12, %v238_v44  ;;  %v550_v49 = vpop.f32.mrf.mxu0  ;;  %v558_v50 = vpop.f32.mrf.mxu1  ;;  %v333_v53 = vmax.f32 %v317_v41, 0.0  ;;  %v341_v54 = vmax.f32 %v325_v42, 0.0 }
  0xdb   :  { %483 = vst [vmem:[%s669_s3] sm:$0xff] %v482_v45   ;;  %522 = vst [vmem:[%s669_s3 + $0x20] sm:$0xff] %v502_v46   ;;  %v318_v51 = vadd.f32 %v550_v49, %v446_v12  ;;  %v326_v52 = vadd.f32 %v558_v50, %v446_v12  ;;  %v331_v61 = vmax.f32 %v315_v47, 0.0 }
  0xdc   :  { %v209_v55 = vpop.f32.mrf.mxu0  ;;  %v241_v56 = vpop.f32.mrf.mxu1  ;;  %v339_v62 = vmax.f32 %v323_v48, 0.0 }
  0xdd   :  { %v334_v57 = vmax.f32 %v318_v51, 0.0  ;;  %v342_v58 = vmax.f32 %v326_v52, 0.0  ;;  %v316_v59 = vadd.f32 %v446_v12, %v209_v55  ;;  %v324_v60 = vadd.f32 %v446_v12, %v241_v56 }
  0xdf   :  { %v497_v63 = vpack.c.bf16 %v334_v57, %v333_v53  ;;  %v517_v0 = vpack.c.bf16 %v342_v58, %v341_v54  ;;  %v332_v1 = vmax.f32 %v316_v59, 0.0  ;;  %v340_v2 = vmax.f32 %v324_v60, 0.0 }
  0xe1   :  { %521 = vst [vmem:[%s669_s3 + $0x18] sm:$0xff] %v497_v63   ;;  %525 = vst [vmem:[%s669_s3 + $0x38] sm:$0xff] %v517_v0   ;;  %v492_v3 = vpack.c.bf16 %v332_v1, %v331_v61  ;;  %v512_v4 = vpack.c.bf16 %v340_v2, %v339_v62 }
  0xe3   :  { %520 = vst [vmem:[%s669_s3 + $0x10] sm:$0xff] %v492_v3   ;;  %524 = vst [vmem:[%s669_s3 + $0x30] sm:$0xff] %v512_v4  }

// kernel: deeplabv3_forward.4
= control target key start
LH: loop header
LB: loop body
LE: loop exit
PB: predicated region body
PF: predicated region fallthrough
CT: control target
= control target key end

     0   :  { %v300_v0 = vmov 0   ;;  %vm121_vm0 = vcmask 130048   ;;  %s369_s1 = inlined_call_operand.vmem [shape: bf16[144,128], index: 1, kind: input, shape index: {}]   ;;  %s370_s0 = inlined_call_operand.vmem [shape: bf16[32,144], index: 0, kind: input, shape index: {}]   ;;  %s371_s2 = inlined_call_operand.vmem [shape: f32[1,128], index: 2, kind: input, shape index: {}]   ;;  %s372_s3 = inlined_call_operand.vmem [shape: bf16[32,128], index: 3, kind: output, shape index: {}]  }
   0x1   :  { %128 = vmatprep.subr.bf16.mxu0 %v300_v0  ;;  %266 = vmatprep.subr.bf16.mxu1 %v300_v0  ;;  %v285_v1 = vld [vmem:[%s369_s1 + $0x38] sm:$0xff]   ;;  %v286_v2 = vld [vmem:[%s369_s1 + $0x30] sm:$0xff]   ;;  %v287_v3 = vld [vmem:[%s369_s1 + $0x28] sm:$0xff]  }
   0x2   :  { %129 = vmatpush1.bf16.msra.mxu0 %v285_v1  ;;  %275 = vmatpush1.bf16.msra.mxu1 %v285_v1  ;;  %v288_v4 = vld [vmem:[%s369_s1 + $0x20] sm:$0xff]   ;;  %v299_v6 = vld [vmem:[%s370_s0 + $0x14] ss:$8 sps:$4 sm:$0xff]   ;;  %v291_v9 = vld [vmem:[%s369_s1 + $0x8] sm:$0xff]  }
   0x3   :  { %130 = vmatprep.subr.bf16.mxu0 %v300_v0  ;;  %267 = vmatprep.subr.bf16.mxu1 %v300_v0  ;;  %v296_v5 = vld [vmem:[%s370_s0 + $0x4] ss:$8 sps:$4 sm:$0xff]   ;;  %v289_v7 = vld [vmem:[%s369_s1 + $0x18] sm:$0xff]   ;;  %v290_v8 = vld [vmem:[%s369_s1 + $0x10] sm:$0xff]  }
   0x4   :  { %244 = vmatprep.mubr.msk.bf16.mxu0 %vm121_vm0, %v296_v5  ;;  %245 = vmatprep.mubr.msk.bf16.mxu1 %vm121_vm0, %v299_v6  ;;  %v292_v10 = vld [vmem:[%s369_s1] sm:$0xff]   ;;  %v297_v13 = vld [vmem:[%s370_s0 + $0x10] ss:$8 sps:$4 sm:$0xff]  }
   0x5   :  { %v293_v11 = vld [vmem:[%s369_s1 + $0x40] sm:$0xff]  }
   0x6   :  { %131 = vmatpush1.bf16.msra.mxu0 %v286_v2  ;;  %276 = vmatpush1.bf16.msra.mxu1 %v286_v2  ;;  %v294_v12 = vld [vmem:[%s370_s0] ss:$8 sps:$4 sm:$0xff]  }
   0x7   :  { %132 = vmatprep.subr.bf16.mxu0 %v300_v0  ;;  %268 = vmatprep.subr.bf16.mxu1 %v300_v0  ;;  %v246_v15 = vld [vmem:[%s371_s2] ss:$0 sm:$0xff] }
   0xa   :  { %133 = vmatpush1.bf16.msra.mxu0 %v287_v3  ;;  %277 = vmatpush1.bf16.msra.mxu1 %v287_v3 }
   0xb   :  { %134 = vmatprep.subr.bf16.mxu0 %v300_v0  ;;  %269 = vmatprep.subr.bf16.mxu1 %v300_v0 }
   0xe   :  { %135 = vmatpush1.bf16.msra.mxu0 %v288_v4  ;;  %278 = vmatpush1.bf16.msra.mxu1 %v288_v4 }
   0xf   :  { %136 = vmatprep.subr.bf16.mxu0 %v300_v0  ;;  %270 = vmatprep.subr.bf16.mxu1 %v300_v0 }
  0x12   :  { %137 = vmatpush1.bf16.msra.mxu0 %v289_v7  ;;  %279 = vmatpush1.bf16.msra.mxu1 %v289_v7 }
  0x13   :  { %138 = vmatprep.subr.bf16.mxu0 %v300_v0  ;;  %271 = vmatprep.subr.bf16.mxu1 %v300_v0 }
  0x16   :  { %139 = vmatpush1.bf16.msra.mxu0 %v290_v8  ;;  %280 = vmatpush1.bf16.msra.mxu1 %v290_v8 }
  0x17   :  { %140 = vmatprep.subr.bf16.mxu0 %v300_v0  ;;  %272 = vmatprep.subr.bf16.mxu1 %v300_v0 }
  0x1a   :  { %141 = vmatpush1.bf16.msra.mxu0 %v291_v9  ;;  %281 = vmatpush1.bf16.msra.mxu1 %v291_v9 }
  0x1b   :  { %142 = vmatprep.subr.bf16.mxu0 %v300_v0  ;;  %273 = vmatprep.subr.bf16.mxu1 %v300_v0 }
  0x1e   :  { %143 = vmatpush1.bf16.msra.mxu0 %v292_v10  ;;  %282 = vmatpush1.bf16.msra.mxu1 %v292_v10 }
  0x1f   :  { %158 = vmatprep.subr.bf16.mxu0 %v300_v0  ;;  %274 = vmatprep.subr.bf16.mxu1 %v300_v0 }
  0x22   :  { %159 = vmatpush2.bf16.msra.mxu0 %v293_v11  ;;  %283 = vmatpush2.bf16.msra.mxu1 %v293_v11 }
  0x25   :  { %161 = vmatmul.mubr.bf16.vlgmr.msra.gmra.mxu0 %v294_v12  ;;  %169 = vmatmul.mubr.bf16.vlgmr.msra.gmra.mxu1 %v297_v13 }
  0xe5   :  { %v162_v14 = vpop.f32.mrf.mxu0  ;;  %v170_v16 = vpop.f32.mrf.mxu1 }
  0xe6   :  { %v199_v19 = vadd.f32 %v246_v15, %v162_v14  ;;  %v201_v20 = vadd.f32 %v246_v15, %v170_v16 }
  0xe7   :  { %v164_v17 = vpop.f32.mrf.mxu0  ;;  %v172_v18 = vpop.f32.mrf.mxu1 }
  0xe8   :  { %v203_v27 = vmax.f32 %v199_v19, 0.0  ;;  %v205_v28 = vmax.f32 %v201_v20, 0.0 }
  0xe9   :  { %v165_v21 = vpop.f32.mrf.mxu0  ;;  %v173_v22 = vpop.f32.mrf.mxu1 }
  0xea   :  { %v200_v23 = vadd.f32 %v246_v15, %v165_v21  ;;  %v202_v24 = vadd.f32 %v246_v15, %v173_v22 }
  0xeb   :  { %v167_v25 = vpop.f32.mrf.mxu0  ;;  %v175_v26 = vpop.f32.mrf.mxu1 }
  0xec   :  { %v204_v29 = vmax.f32 %v200_v23, 0.0  ;;  %v206_v30 = vmax.f32 %v202_v24, 0.0 }
  0xee   :  { %v258_v31 = vpack.c.bf16 %v204_v29, %v203_v27  ;;  %v263_v32 = vpack.c.bf16 %v206_v30, %v205_v28 }
  0xf0   :  { %259 = vst [vmem:[%s372_s3] sm:$0xff] %v258_v31   ;;  %265 = vst [vmem:[%s372_s3 + $0x8] sm:$0xff] %v263_v32  }

// kernel: deeplabv3_forward.5
= control target key start
LH: loop header
LB: loop body
LE: loop exit
PB: predicated region body
PF: predicated region fallthrough
CT: control target
= control target key end

     0   :  { %s1495_s19 = smov 0   ;;  %s1699_s0 = inlined_call_operand.vmem [shape: bf16[2,32,128], index: 0, kind: input, shape index: {}]   ;;  %s1700_s1 = inlined_call_operand.vmem [shape: f32[2,32,1], index: 1, kind: input, shape index: {}]   ;;  %s1701_s2 = inlined_call_operand.vmem [shape: bf16[16,32], index: 2, kind: input, shape index: {}]   ;;  %s1702_s3 = inlined_call_operand.vmem [shape: bf16[16,288], index: 3, kind: input, shape index: {}]   ;;  %s1703_s4 = inlined_call_operand.vmem [shape: bf16[16,288], index: 4, kind: input, shape index: {}]   ;;  %s1704_s5 = inlined_call_operand.vmem [shape: f32[48,1], index: 5, kind: input, shape index: {}]   ;;  %s1705_s6 = inlined_call_operand.vmem [shape: bf16[32,48], index: 6, kind: input, shape index: {}]   ;;  %s1706_s7 = inlined_call_operand.vmem [shape: f32[32,1], index: 7, kind: input, shape index: {}]   ;;  %s1707_s8 = inlined_call_operand.vmem [shape: bf16[1,32], index: 8, kind: input, shape index: {}]   ;;  %s1708_s9 = inlined_call_operand.<no memory space> [shape: f32[1,1], index: 9, kind: input, shape index: {}]   ;;  %s1709_s10 = inlined_call_operand.vmem [shape: f32[40,256], index: 10, kind: input, shape index: {}]   ;;  %s1710_s11 = inlined_call_operand.vmem [shape: f32[2,1,256], index: 11, kind: output, shape index: {}]  }
   0x1   :  { %v16_v0 = vstv %s1708_s9 }
   0x2   :  { %17 = vst [vmem:[#allocation2] sm:$0x1] %v16_v0 }
   0x3 LB: > { %s1224_s20 = sadd.s32 4294967295, %s1409_s19   ;;  %p1228_p0 = scmp.ge.s32.totalorder %s1409_s19, 1  ;;  %s1409_s19 = sphi %s1495_s19, %s23_s19  }
   0x4   : > { %p349_p1 = scmp.lt.s32.totalorder %s1409_s19, 3 }
   0x6   : > { %p350_p2 = pnand %p1228_p0, %p349_p1 }
   0x7   : > { %p393_p3 = scmp.lt.s32.totalorder (!%p350_p2), %s1224_s20, 1  ;;  %s1411_s24 = smov (!%p350_p2), 84  }
   0x8   : > { %353 = sbr.rel (%p350_p2) target bundleno = 1144 (0x478), region = 64  ;;  %s1412_s25 = smov (!%p350_p2), 108  }
   0x9   : > { %s1413_s26 = smov (!%p350_p2), 86   ;;  %s1414_s27 = smov (!%p350_p2), 88  }
   0xa   : > { %s1415_s28 = smov (!%p350_p2), 124   ;;  %s1416_s29 = smov (!%p350_p2), 104  }
   0xb   : > { %s1417_s30 = smov (!%p350_p2), 126   ;;  %s1418_s12 = smov (!%p350_p2), 106  }
   0xc   : > { %s1419_s13 = smov (!%p350_p2), 95   ;;  %s1420_s14 = smov (!%p350_p2), 65  }
   0xd   : > { %s1712_s20 = smov (!%p393_p3, %s1224_s20), 1  ;;  %s1421_s15 = smov 98   ;;  %v1423_v3 = vmov 0.0   ;;  %vm1424_vm0 = vmmov 0   ;;  %v1392_v22 = vld [vmem:[%s1701_s2] sm:$0xff]   ;;  %vm511_vm1 = vcmask 261120  }
   0xe   : > { %s1254_s9 = sshll.u32 %s1712_s20, 4  ;;  %s1422_s16 = smov 68   ;;  %1317 = vmatprep.subr.bf16.mxu0 %v1423_v3  ;;  %1321 = vmatprep.mubr.msk.bf16.mxu0 %vm1424_vm0, %v1423_v3  ;;  %v1399_v23 = vld [vmem:[%s1702_s3 + $0x4] ss:$12 sps:$4 sm:$0xff]   ;;  %v1430_v25 = vmov 0   ;;  %v821_v26 = vld [vmem:[%s1704_s5 + $0x18] sm:$0xff] }
   0xf   : > { %s397_s23 = scalar_lea.vmem %s1699_s0, %s1254_s9  ;;  %s1425_s17 = smov 122   ;;  %664 = vmatprep.mubr.bf16.mxu1 %v1399_v23  ;;  %v822_v24 = vld [vmem:[%s1704_s5 + $0x20] sm:$0xff]  ;;  %1389 = vset.pattern.permute.xlu1 %v1430_v25  ;;  %v823_v27 = vld [vmem:[%s1704_s5 + $0x28] sm:$0xff]  ;;  %v820_v29 = vld [vmem:[%s1704_s5 + $0x10] sm:$0xff]  ;;  %vm907_vm2 = vcmask 392192   ;;  %vm1061_vm3 = vcmask 326656  }
  0x10   : > { %v1509_v1 = vld [vmem:[%s397_s23 + $0x8] sm:$0xff]   ;;  %v1513_v2 = vld [vmem:[%s397_s23] sm:$0xff]   ;;  %s1426_s18 = smov 117   ;;  %s1427_s9 = smov 92   ;;  %1388 = vset.pattern.permute.xlu0 %v1430_v25  ;;  %v966_v32 = vld [vmem:[%s1706_s7 + $0x18] sm:$0xff] }
  0x11   : > { %452 = vrot.lane.b32.xlu0 %v1509_v1, %s1411_s24  ;;  %432 = vrot.lane.b32.xlu1 %v1509_v1, %s1412_s25  ;;  %s1428_s21 = smov 125   ;;  %s1429_s22 = smov 62   ;;  %v819_v28 = vld [vmem:[%s1704_s5 + $0x8] sm:$0xff]  ;;  %v818_v31 = vld [vmem:[%s1704_s5] sm:$0xff] }
  0x12   : > { %v965_v36 = vld [vmem:[%s1706_s7 + $0x10] sm:$0xff]  ;;  %v964_v37 = vld [vmem:[%s1706_s7 + $0x8] sm:$0xff]  ;;  %v963_v40 = vld [vmem:[%s1706_s7] sm:$0xff] }
  0x13   : > { %v998_v42 = vld [vmem:[#allocation2] sm:$0x1]  ;;  %v1393_v51 = vld [vmem:[%s1702_s3 + $0x8] ss:$12 sps:$4 sm:$0xff]   ;;  %v1396_v52 = vld [vmem:[%s1703_s4 + $0x4] ss:$12 sps:$4 sm:$0xff]  }
  0x15   : > { %448 = vrot.lane.b32.xlu0 %v1509_v1, %s1413_s26  ;;  %450 = vrot.lane.b32.xlu1 %v1513_v2, %s1411_s24 }
  0x19   : > { %446 = vrot.lane.b32.xlu0 %v1513_v2, %s1413_s26  ;;  %430 = vrot.lane.b32.xlu1 %v1513_v2, %s1412_s25 }
  0x1d   : > { %444 = vrot.lane.b32.xlu0 %v1509_v1, %s1414_s27  ;;  %428 = vrot.lane.b32.xlu1 %v1509_v1, %s1415_s28 }
  0x21   : > { %442 = vrot.lane.b32.xlu0 %v1513_v2, %s1414_s27  ;;  %426 = vrot.lane.b32.xlu1 %v1513_v2, %s1415_s28 }
  0x25   : > { %440 = vrot.lane.b32.xlu0 %v1509_v1, %s1416_s29  ;;  %424 = vrot.lane.b32.xlu1 %v1509_v1, %s1417_s30 }
  0x29   : > { %438 = vrot.lane.b32.xlu0 %v1513_v2, %s1416_s29  ;;  %422 = vrot.lane.b32.xlu1 %v1513_v2, %s1417_s30 }
  0x2d   : > { %436 = vrot.lane.b32.xlu0 %v1509_v1, %s1418_s12  ;;  %434 = vrot.lane.b32.xlu1 %v1513_v2, %s1418_s12 }
  0x31   : > { %476 = vrot.lane.b32.xlu0 %v1509_v1, %s1419_s13  ;;  %474 = vrot.lane.b32.xlu1 %v1513_v2, %s1419_s13 }
  0x35   : > { %494 = vrot.lane.b32.xlu0 %v1509_v1, %s1420_s14 }
  0x39   : > { %470 = vrot.lane.b32.xlu0 %v1509_v1, %s1421_s15 }
  0x3d   : > { %492 = vrot.lane.b32.xlu0 %v1513_v2, %s1420_s14  ;;  %s1233_s14 = sshll.u32 %s1712_s20, 1 }
  0x41   : > { %468 = vrot.lane.b32.xlu0 %v1513_v2, %s1421_s15 }
  0x45   : > { %488 = vrot.lane.b32.xlu0 %v1509_v1, %s1422_s16 }
  0x49   : > { %464 = vrot.lane.b32.xlu0 %v1509_v1, %s1425_s17 }
  0x83   : > { %v453_v4 = vpop.permute.xlu0 %452  ;;  %v433_v5 = vpop.permute.xlu1 %432 }
  0x84   : > { %609 = vrot.lane.b32.xlu0 %v453_v4, %s1426_s18 }
  0x87   : > { %v449_v6 = vpop.permute.xlu0 %448  ;;  %v451_v7 = vpop.permute.xlu1 %450 }
  0x88   : > { %589 = vrot.lane.b32.xlu0 %v433_v5, %s1426_s18  ;;  %605 = vrot.lane.b32.xlu1 %v449_v6, %s1426_s18  ;;  %v1394_v5 = vld [vmem:[%s1703_s4] ss:$12 sps:$4 sm:$0xff]  }
  0x8b   : > { %v447_v8 = vpop.permute.xlu0 %446  ;;  %v431_v9 = vpop.permute.xlu1 %430 }
  0x8c   : > { %607 = vrot.lane.b32.xlu1 %v451_v7, %s1426_s18  ;;  %486 = vrot.lane.b32.xlu0 %v1513_v2, %s1422_s16  ;;  %s1255_s16 = sshll.u32 %s1712_s20, 5 }
  0x8f   : > { %v445_v10 = vpop.permute.xlu0 %444  ;;  %v429_v11 = vpop.permute.xlu1 %428 }
  0x90   : > { %603 = vrot.lane.b32.xlu1 %v447_v8, %s1426_s18  ;;  %462 = vrot.lane.b32.xlu0 %v1513_v2, %s1425_s17  ;;  %s406_s17 = scalar_lea.vmem %s1710_s11, %s1233_s14 }
  0x93   : > { %v443_v12 = vpop.permute.xlu0 %442  ;;  %v427_v13 = vpop.permute.xlu1 %426 }
  0x94   : > { %587 = vrot.lane.b32.xlu1 %v431_v9, %s1426_s18  ;;  %482 = vrot.lane.b32.xlu0 %v1509_v1, %s1427_s9 }
  0x97   : > { %v441_v14 = vpop.permute.xlu0 %440  ;;  %v425_v15 = vpop.permute.xlu1 %424 }
  0x98   : > { %601 = vrot.lane.b32.xlu1 %v445_v10, %s1426_s18  ;;  %458 = vrot.lane.b32.xlu0 %v1509_v1, %s1428_s21 }
  0x9b   : > { %v439_v16 = vpop.permute.xlu0 %438  ;;  %v423_v17 = vpop.permute.xlu1 %422 }
  0x9c   : > { %585 = vrot.lane.b32.xlu1 %v429_v11, %s1426_s18  ;;  %480 = vrot.lane.b32.xlu0 %v1513_v2, %s1427_s9  ;;  %s402_s9 = scalar_lea.vmem %s1700_s1, %s1255_s16 }
  0x9d   : > { %v876_v30 = vld [vmem:[%s402_s9 + $0x18] sm:$0xff]  ;;  %v875_v33 = vld [vmem:[%s402_s9 + $0x10] sm:$0xff]  ;;  %v874_v34 = vld [vmem:[%s402_s9 + $0x8] sm:$0xff] }
  0x9e   : > { %v873_v39 = vld [vmem:[%s402_s9] sm:$0xff] }
  0x9f   : > { %v437_v18 = vpop.permute.xlu0 %436  ;;  %v435_v19 = vpop.permute.xlu1 %434 }
  0xa0   : > { %599 = vrot.lane.b32.xlu1 %v443_v12, %s1426_s18  ;;  %456 = vrot.lane.b32.xlu0 %v1513_v2, %s1428_s21 }
  0xa3   : > { %v1557_v20 = vpop.permute.xlu0 %476  ;;  %v1561_v21 = vpop.permute.xlu1 %474 }
  0xa4   : > { %583 = vrot.lane.b32.xlu1 %v427_v13, %s1426_s18  ;;  %591 = vrot.lane.b32.xlu0 %v435_v19, %s1426_s18  ;;  %v1400_v13 = vld [vmem:[%s1703_s4 + $0x8] ss:$12 sps:$4 sm:$0xff]  }
  0xa5   : > { %1318 = vmatpush3.bf16.msra.mxu0 %v1557_v20 }
  0xa6   : > { %1319 = vmatprep.subr.bf16.mxu0 %v1423_v3 }
  0xa7   : > { %v495_v35 = vpop.permute.xlu0 %494 }
  0xa8   : > { %597 = vrot.lane.b32.xlu1 %v441_v14, %s1426_s18  ;;  %500 = vrot.lane.b32.xlu0 %v1509_v1, %s1429_s22 }
  0xa9   : > { %1320 = vmatpush3.bf16.msra.mxu0 %v1561_v21 }
  0xaa   : > { %1325 = vmatprep.subr.bf16.mxu0 %v1423_v3 }
  0xab   : > { %v471_v38 = vpop.permute.xlu0 %470 }
  0xac   : > { %581 = vrot.lane.b32.xlu1 %v425_v15, %s1426_s18  ;;  %1322 = vmatmul.mubr.msk.bf16.vlgmr.msra.gmra.mxu0 %vm511_vm1, %v1392_v22 }
  0xad   : > { %1329 = vmatprep.mubr.msk.bf16.mxu0 %vm1424_vm0, %v1423_v3  ;;  %846 = vperm.xlu0 %1388, %v822_v24  }
  0xaf   : > { %v493_v41 = vpop.permute.xlu0 %492 }
  0xb0   : > { %595 = vrot.lane.b32.xlu1 %v439_v16, %s1426_s18 }
  0xb1   : > { %841 = vperm.xlu0 %1388, %v821_v26  }
  0xb3   : > { %v469_v43 = vpop.permute.xlu0 %468 }
  0xb4   : > { %579 = vrot.lane.b32.xlu1 %v423_v17, %s1426_s18 }
  0xb5   : > { %831 = vperm.xlu0 %1388, %v819_v28  }
  0xb7   : > { %v489_v44 = vpop.permute.xlu0 %488 }
  0xb8   : > { %593 = vrot.lane.b32.xlu1 %v437_v18, %s1426_s18 }
  0xb9   : > { %894 = vperm.xlu0 %1388, %v876_v30  }
  0xbb   : > { %v465_v45 = vpop.permute.xlu0 %464 }
  0xbc   : > { %577 = vrot.lane.b32.xlu1 %v1509_v1, %s1426_s18 }
  0xbd   : > { %984 = vperm.xlu0 %1388, %v966_v32  }
  0xc0   : > { %575 = vrot.lane.b32.xlu1 %v1513_v2, %s1426_s18 }
  0xc1   : > { %884 = vperm.xlu0 %1388, %v874_v34  }
  0xc4   : > { %498 = vrot.lane.b32.xlu1 %v1513_v2, %s1429_s22 }
  0xc5   : > { %974 = vperm.xlu0 %1388, %v964_v37  }
  0xc8   : > { %851 = vperm.xlu1 %1389, %v823_v27  }
  0xcc   : > { %836 = vperm.xlu1 %1389, %v820_v29   ;;  %v1401_v29 = vld [vmem:[%s1705_s6] sm:$0xff]  }
  0xd0   : > { %826 = vperm.xlu1 %1389, %v818_v31  }
  0xd4   : > { %889 = vperm.xlu1 %1389, %v875_v33  }
  0xd8   : > { %979 = vperm.xlu1 %1389, %v965_v36  }
  0xdc   : > { %879 = vperm.xlu1 %1389, %v873_v39  }
  0xe0   : > { %969 = vperm.xlu1 %1389, %v963_v40  }
  0xe4   : > { %1001 = vperm.xlu1 %1389, %v998_v42  }
  0xf6   : > { %v610_v46 = vpop.permute.xlu0 %609 }
  0xf7   : > { %1326 = vmatpush3.bf16.msra.mxu0 %v610_v46 }
  0xf8   : > { %1327 = vmatprep.subr.bf16.mxu0 %v1423_v3 }
  0xfa   : > { %v590_v47 = vpop.permute.xlu0 %589  ;;  %v606_v48 = vpop.permute.xlu1 %605 }
  0xfb   : > { %1259 = vmatprep.subr.bf16.mxu1 %v606_v48 }
  0xfc   : > { %1260 = vmatpush3.bf16.msra.mxu1 %v590_v47 }
  0xfe   : > { %v608_v49 = vpop.permute.xlu1 %607  ;;  %v487_v50 = vpop.permute.xlu0 %486 }
  0xff   : > { %1328 = vmatpush3.bf16.msra.mxu0 %v608_v49 }
 0x100   : > { %1284 = vmatprep.subr.bf16.mxu0 %v495_v35 }
 0x102   : > { %v604_v53 = vpop.permute.xlu1 %603  ;;  %1330 = vmatmul.mubr.msk.bf16.vlgmr.msra.gmra.mxu0 %vm511_vm1, %v1393_v51  ;;  %v463_v54 = vpop.permute.xlu0 %462 }
 0x103   : > { %1261 = vmatprep.subr.bf16.mxu1 %v604_v53  ;;  %1285 = vmatpush3.bf16.msra.mxu0 %v471_v38 }
 0x104   : > { %1286 = vmatprep.subr.bf16.mxu0 %v493_v41  ;;  %768 = vmatprep.mubr.bf16.mxu0 %v1396_v52 }
 0x106   : > { %v588_v55 = vpop.permute.xlu1 %587  ;;  %v483_v56 = vpop.permute.xlu0 %482 }
 0x107   : > { %1262 = vmatpush3.bf16.msra.mxu1 %v588_v55  ;;  %1287 = vmatpush3.bf16.msra.mxu0 %v469_v43 }
 0x108   : > { %1288 = vmatprep.subr.bf16.mxu0 %v489_v44 }
 0x10a   : > { %v602_v57 = vpop.permute.xlu1 %601  ;;  %v459_v58 = vpop.permute.xlu0 %458 }
 0x10b   : > { %1263 = vmatprep.subr.bf16.mxu1 %v602_v57  ;;  %1289 = vmatpush3.bf16.msra.mxu0 %v465_v45 }
 0x10c   : > { %1290 = vmatprep.subr.bf16.mxu0 %v487_v50 }
 0x10e   : > { %v586_v59 = vpop.permute.xlu1 %585  ;;  %v481_v60 = vpop.permute.xlu0 %480 }
 0x10f   : > { %1264 = vmatpush3.bf16.msra.mxu1 %v586_v59  ;;  %1291 = vmatpush3.bf16.msra.mxu0 %v463_v54 }
 0x110   : > { %1292 = vmatprep.subr.bf16.mxu0 %v483_v56 }
 0x112   : > { %v600_v61 = vpop.permute.xlu1 %599  ;;  %v457_v62 = vpop.permute.xlu0 %456 }
 0x113   : > { %1265 = vmatprep.subr.bf16.mxu1 %v600_v61  ;;  %1293 = vmatpush3.bf16.msra.mxu0 %v459_v58 }
 0x114   : > { %1294 = vmatprep.subr.bf16.mxu0 %v481_v60 }
 0x116   : > { %v584_v63 = vpop.permute.xlu1 %583  ;;  %v592_v8 = vpop.permute.xlu0 %591 }
 0x117   : > { %1266 = vmatpush3.bf16.msra.mxu1 %v584_v63  ;;  %1295 = vmatpush3.bf16.msra.mxu0 %v457_v62 }
 0x118   : > { %1296 = vmatprep.subr.bf16.mxu0 %v1557_v20 }
 0x11a   : > { %v598_v0 = vpop.permute.xlu1 %597  ;;  %v501_v11 = vpop.permute.xlu0 %500 }
 0x11b   : > { %1267 = vmatprep.subr.bf16.mxu1 %v598_v0  ;;  %1297 = vmatpush3.bf16.msra.mxu0 %v1509_v1  ;;  %v1402_v0 = vld [vmem:[%s1705_s6 + $0x8] sm:$0xff]  }
 0x11c   : > { %1298 = vmatprep.subr.bf16.mxu0 %v1561_v21 }
 0x11e   : > { %v582_v4 = vpop.permute.xlu1 %581 }
 0x11f   : > { %1268 = vmatpush3.bf16.msra.mxu1 %v582_v4  ;;  %1299 = vmatpush3.bf16.msra.mxu0 %v1513_v2  ;;  %v1397_v2 = vld [vmem:[%s1702_s3] ss:$12 sps:$4 sm:$0xff]  }
 0x120   : > { %1351 = vmatprep.subr.bf16.mxu0 %v1423_v3  ;;  %v1060_v4 = vld [vmem:[%s1709_s10 + $0x48] sm:$0xff] }
 0x122   : > { %v596_v6 = vpop.permute.xlu1 %595  ;;  %769 = vmatmul.mubr.bf16.vlgmr.msra.gmra.mxu0 %v1394_v5  ;;  %v1059_v5 = vld [vmem:[%s1709_s10 + $0x40] sm:$0xff] }
 0x123   : > { %1269 = vmatprep.subr.bf16.mxu1 %v596_v6  ;;  %1355 = vmatprep.mubr.msk.bf16.mxu0 %vm1424_vm0, %v1423_v3  ;;  %v1058_v6 = vld [vmem:[%s1709_s10 + $0x38] sm:$0xff] }
 0x126   : > { %v580_v7 = vpop.permute.xlu1 %579 }
 0x127   : > { %1270 = vmatpush3.bf16.msra.mxu1 %v580_v7  ;;  %v1057_v7 = vld [vmem:[%s1709_s10 + $0x30] sm:$0xff] }
 0x128   : > { %v847_v15 = vpop.permute.xlu0 %846 }
 0x12a   : > { %v594_v1 = vpop.permute.xlu1 %593 }
 0x12b   : > { %1271 = vmatprep.subr.bf16.mxu1 %v594_v1  ;;  %v1056_v1 = vld [vmem:[%s1709_s10 + $0x28] sm:$0xff] }
 0x12c   : > { %v842_v17 = vpop.permute.xlu0 %841 }
 0x12e   : > { %v578_v9 = vpop.permute.xlu1 %577 }
 0x12f   : > { %1272 = vmatpush3.bf16.msra.mxu1 %v578_v9  ;;  %v1054_v9 = vld [vmem:[%s1709_s10 + $0x18] sm:$0xff] }
 0x130   : > { %1273 = vmatprep.subr.bf16.mxu1 %v592_v8  ;;  %v832_v22 = vpop.permute.xlu0 %831  ;;  %v1055_v8 = vld [vmem:[%s1709_s10 + $0x20] sm:$0xff] }
 0x132   : > { %v576_v10 = vpop.permute.xlu1 %575 }
 0x133   : > { %1274 = vmatpush3.bf16.msra.mxu1 %v576_v10 }
 0x134   : > { %1333 = vmatprep.subr.bf16.mxu1 %v1423_v3 }
 0x136   : > { %665 = vmatmul.mubr.bf16.vlgmr.msra.gmra.mxu1 %v1397_v2  ;;  %v499_v12 = vpop.permute.xlu1 %498  ;;  %v895_v2 = vpop.permute.xlu0 %894 }
 0x137   : > { %1334 = vmatpush3.bf16.msra.mxu1 %v501_v11  ;;  %1337 = vmatprep.mubr.msk.bf16.mxu1 %vm1424_vm0, %v1423_v3 }
 0x138   : > { %1335 = vmatprep.subr.bf16.mxu1 %v1423_v3 }
 0x13b   : > { %1336 = vmatpush3.bf16.msra.mxu1 %v499_v12  ;;  %v985_v12 = vpop.permute.xlu0 %984 }
 0x13e   : > { %1338 = vmatmul.mubr.msk.bf16.vlgmr.msra.gmra.mxu1 %vm511_vm1, %v1400_v13 }
 0x13f   : > { %1347 = vmatprep.mubr.msk.bf16.mxu1 %vm907_vm2, %v1401_v29 }
 0x143   : > { %v852_v14 = vpop.permute.xlu1 %851 }
 0x147   : > { %v837_v16 = vpop.permute.xlu1 %836 }
 0x14b   : > { %v827_v18 = vpop.permute.xlu1 %826 }
 0x14f   : > { %v890_v10 = vpop.permute.xlu1 %889 }
 0x153   : > { %v980_v11 = vpop.permute.xlu1 %979 }
 0x16c   : > { %v549_v19 = vpop.f32.mrf.mxu0 }
 0x16d   : > { %v854_v20 = vadd.f32 %v827_v18, %v549_v19 }
 0x16e   : > { %v1323_v21 = vpop.f32.mrf.mxu0 }
 0x16f   : > { %v860_v25 = vmax.f32 %v854_v20, 0.0 }
 0x170   : > { %v552_v23 = vpop.f32.mrf.mxu0 }
 0x171   : > { %v855_v24 = vadd.f32 %v832_v22, %v552_v23 }
 0x172   : > { %v1324_v26 = vpop.f32.mrf.mxu0 }
 0x173   : > { %v861_v27 = vmax.f32 %v855_v24, 0.0 }
 0x175   : > { %v866_v28 = vpack.c.bf16 %v861_v27, %v860_v25 }
 0x1c2   : > { %v707_v30 = vpop.f32.mrf.mxu0 }
 0x1c4   : > { %v1331_v31 = vpop.f32.mrf.mxu0 }
 0x1c6   : > { %v710_v32 = vpop.f32.mrf.mxu0 }
 0x1c8   : > { %v1332_v33 = vpop.f32.mrf.mxu0 }
 0x1e2   : > { %v1300_v34 = vpop.f32.mrf.mxu0 }
 0x1e4   : > { %v1301_v36 = vpop.f32.mrf.mxu0 }
 0x1e5   : > { %v1302_v41 = vadd.f32 %v1301_v36, %v1300_v34  ;;  %v1053_v36 = vld [vmem:[%s1709_s10 + $0x10] sm:$0xff] }
 0x1e6   : > { %v1303_v38 = vpop.f32.mrf.mxu0 }
 0x1e8   : > { %v1304_v44 = vpop.f32.mrf.mxu0 }
 0x1e9   : > { %v1305_v50 = vadd.f32 %v1304_v44, %v1303_v38  ;;  %v1004_v38 = vlaneseq }
 0x1eb   : > { %vm1156_vm4 = vcmp.lt.s32.totalorder %v1004_v38, 256 }
 0x1f6   : > { %v1275_v35 = vpop.f32.mrf.mxu1 }
 0x1f8   : > { %v1276_v37 = vpop.f32.mrf.mxu1 }
 0x1f9   : > { %v1277_v42 = vadd.f32 %v1276_v37, %v1275_v35  ;;  %v997_v35 = vld [vmem:[%s1707_s8] sm:$0x1]  ;;  %v1052_v37 = vld [vmem:[%s1709_s10 + $0x8] sm:$0xff] }
 0x1fa   : > { %v1278_v39 = vpop.f32.mrf.mxu1 }
 0x1fb   : > { %v708_v49 = vadd.f32 %v1277_v42, %v707_v30 }
 0x1fc   : > { %v1279_v40 = vpop.f32.mrf.mxu1 }
 0x1fd   : > { %v1280_v43 = vadd.f32 %v1279_v40, %v1278_v39  ;;  %v856_v56 = vadd.f32 %v837_v16, %v708_v49  ;;  %v885_v16 = vpop.permute.xlu0 %884  ;;  %v1005_v39 = vshrl.u32 %v1004_v38, 7 }
 0x1fe   : > { %v811_v45 = vpop.f32.mrf.mxu1 }
 0x1ff   : > { %v711_v46 = vadd.f32 %v1280_v43, %v710_v32  ;;  %v812_v47 = vadd.f32 %v1302_v41, %v811_v45  ;;  %v862_v61 = vmax.f32 %v856_v56, 0.0  ;;  %v1006_v40 = vsub.s32 0, %v1005_v39 }
 0x200   : > { %v1339_v48 = vpop.f32.mrf.mxu1 }
 0x201   : > { %v857_v52 = vadd.f32 %v842_v17, %v711_v46  ;;  %v858_v53 = vadd.f32 %v847_v15, %v812_v47  ;;  %v975_v26 = vpop.permute.xlu0 %974  ;;  %v1431_v48 = vmov 1966171168  }
 0x202   : > { %v814_v51 = vpop.f32.mrf.mxu1  ;;  %v1140_v49 = vunpack.c.l.s4 %v1431_v48 }
 0x203   : > { %v815_v54 = vadd.f32 %v1305_v50, %v814_v51  ;;  %v863_v58 = vmax.f32 %v857_v52, 0.0  ;;  %v864_v59 = vmax.f32 %v858_v53, 0.0 }
 0x204   : > { %v1340_v55 = vpop.f32.mrf.mxu1  ;;  %v1141_v50 = vunpack.c.0.s8 %v1140_v49 }
 0x205   : > { %v859_v57 = vadd.f32 %v852_v14, %v815_v54  ;;  %v867_v63 = vpack.c.bf16 %v863_v58, %v862_v61  ;;  %v880_v14 = vpop.permute.xlu1 %879 }
 0x206   : > { %v1144_v52 = vsub.s32 %v1141_v50, %v1005_v39 }
 0x207   : > { %v865_v60 = vmax.f32 %v859_v57, 0.0 }
 0x209   : > { %v868_v62 = vpack.c.bf16 %v865_v60, %v864_v59  ;;  %v970_v25 = vpop.permute.xlu1 %969 }
 0x20b   : > { %1341 = vmatprep.subr.bf16.mxu1 %v868_v62 }
 0x20c   : > { %1342 = vmatpush3.bf16.msra.mxu1 %v868_v62 }
 0x20d   : > { %1343 = vmatprep.subr.bf16.mxu1 %v867_v63  ;;  %v1002_v41 = vpop.permute.xlu1 %1001 }
 0x20e   : > { %v1007_v42 = vrot.slane %v1002_v41, %v1006_v40 }
 0x210   : > { %1344 = vmatpush3.bf16.msra.mxu1 %v867_v63 }
 0x211   : > { %1345 = vmatprep.subr.bf16.mxu1 %v866_v28 }
 0x214   : > { %1346 = vmatpush3.bf16.msra.mxu1 %v866_v28 }
 0x215   : > { %1087 = vmatprep.subr.mxu1 %v1060_v4 }
 0x217   : > { %1348 = vmatmul.mubr.msk.bf16.vlgmr.msra.gmra.mxu1 %vm907_vm2, %v1402_v0 }
 0x218   : > { %1129 = vmatprep.mubr.f32.mxu1 %v1423_v3  ;;  %1088 = vmatpush1.msra.mxu1 %v1059_v5 }
 0x219   : > { %1089 = vmatprep.subr.mxu1 %v1058_v6 }
 0x21a   : > { %1090 = vmatpush1.msra.mxu1 %v1057_v7 }
 0x21b   : > { %1091 = vmatprep.subr.mxu1 %v1056_v1 }
 0x21c   : > { %1092 = vmatpush1.msra.mxu1 %v1055_v8 }
 0x21d   : > { %1093 = vmatprep.subr.mxu1 %v1054_v9 }
 0x21e   : > { %1094 = vmatpush1.msra.mxu1 %v1053_v36 }
 0x21f   : > { %1095 = vmatprep.subr.mxu1 %v1052_v37 }
 0x2d7   : > { %v1349_v13 = vpop.f32.mrf.mxu1 }
 0x2d8   : > { %v957_v15 = vadd.f32 %v1349_v13, %v890_v10 }
 0x2d9   : > { %v948_v17 = vpop.f32.mrf.mxu1 }
 0x2da   : > { %v989_v19 = vadd.f32 %v980_v11, %v957_v15  ;;  %v949_v20 = vadd.f32 %v948_v17, %v880_v14 }
 0x2db   : > { %v1350_v18 = vpop.f32.mrf.mxu1 }
 0x2dc   : > { %v960_v21 = vadd.f32 %v1350_v18, %v895_v2  ;;  %v993_v27 = vmax.f32 %v989_v19, 0.0  ;;  %v987_v28 = vadd.f32 %v970_v25, %v949_v20 }
 0x2dd   : > { %v951_v22 = vpop.f32.mrf.mxu1 }
 0x2de   : > { %v990_v23 = vadd.f32 %v985_v12, %v960_v21  ;;  %v952_v24 = vadd.f32 %v951_v22, %v885_v16  ;;  %v991_v33 = vmax.f32 %v987_v28, 0.0 }
 0x2e0   : > { %v994_v29 = vmax.f32 %v990_v23, 0.0  ;;  %v988_v30 = vadd.f32 %v975_v26, %v952_v24 }
 0x2e2   : > { %v996_v31 = vpack.c.bf16 %v994_v29, %v993_v27  ;;  %v992_v32 = vmax.f32 %v988_v30, 0.0 }
 0x2e4   : > { %1352 = vmatpush3.bf16.msra.mxu0 %v996_v31  ;;  %v995_v34 = vpack.c.bf16 %v992_v32, %v991_v33 }
 0x2e5   : > { %1353 = vmatprep.subr.bf16.mxu0 %v1423_v3  ;;  %v1051_v3 = vld [vmem:[%s1709_s10] sm:$0xff] }
 0x2e6   : > { %1096 = vmatpush1.msra.mxu1 %v1051_v3 }
 0x2e8   : > { %1354 = vmatpush3.bf16.msra.mxu0 %v995_v34 }
 0x2eb   : > { %1356 = vmatmul.mubr.msk.bf16.vlgmr.msra.gmra.mxu0 %vm511_vm1, %v997_v35 }
 0x3ab   : > { %v1045_v43 = vpop.f32.mrf.mxu0 }
 0x3ac   : > { %v1046_v44 = vadd.f32 %v1045_v43, %v1007_v42 }
 0x3ad   : > { %v1357_v45 = vpop.f32.mrf.mxu0 }
 0x3ae   : > { %1251 = vmatmul.mubr.msk.f32.vlgmr.msra.gmra.mxu1 %vm1061_vm3, %v1046_v44 }
 0x3af   : > { %v1048_v46 = vpop.f32.mrf.mxu0 }
 0x3b1   : > { %v1358_v47 = vpop.f32.mrf.mxu0 }
 0x46e   : > { %v1131_v51 = vpop.f32.mrf.mxu1 }
 0x470   : > { %v1133_v53 = vpop.f32.mrf.mxu1 }
 0x471   : > { %v1138_v54 = vcombine.low %v1131_v51, %v1133_v53 }
 0x473   : > { %v1145_v55 = vrot.slane %v1138_v54, %v1144_v52 }
 0x475   : > { %v1152_v56 = vrot.slane %v1145_v55, %v1144_v52 }
 0x477   : > { %1158 = vst.msk [vmem:[%s406_s17] sm:$0x3] %vm1156_vm4, %v1152_v56 }
 0x478 PF: > { %s23_s19 = sadd.s32 1, %s1409_s19  }
 0x479   : > { %p20_p4 = scmp.ge.s32.totalorder %s23_s19, 4  }
 0x47b   :  { %22 = sbr.rel (!%p20_p4) target bundleno = 3 (0x3), region = 97 }

</bundles_post_ra>
